<compile_context>
chip_gen: v5e
topology: v5e:2x2
jax: 0.10.0
libtpu: 0.0.40
codegen_flags: <defaults>
</compile_context>

<pallas_src>
from functools import partial

import jax
import jax.numpy as jnp
from jax.experimental import pallas as pl
from jax.experimental.pallas import tpu as pltpu

LOG_STD_MAX = 10.0
LOG_STD_MIN = -10.0

_LANE = 128


def _cdiv(a, b):
    return -(-a // b)


def _round_up(n, m):
    return ((n + m - 1) // m) * m


def _actor_kernel(x_ref, w1_ref, b1_ref, w2_ref, b2_ref, wh_ref, bh_ref,
                  out_ref, *, act_dim):
    # fc1 + relu  (bf16 MXU operands, f32 accumulate / f32 epilogue)
    x = x_ref[...].astype(jnp.bfloat16)           # no-op if wrapper already cast
    h1 = jnp.dot(x, w1_ref[...], preferred_element_type=jnp.float32) + b1_ref[...]
    h1 = jnp.maximum(h1, 0.0).astype(jnp.bfloat16)

    # fc2 + relu
    h2 = jnp.dot(h1, w2_ref[...], preferred_element_type=jnp.float32) + b2_ref[...]
    h2 = jnp.maximum(h2, 0.0).astype(jnp.bfloat16)

    # fused heads: one MXU pass -> [mean | log_std | zero-pad], lane-dense 128
    head = jnp.dot(h2, wh_ref[...], preferred_element_type=jnp.float32) + bh_ref[...]

    # tanh squash + rescale applies only to the log_std lanes; mean lanes raw.
    squashed = LOG_STD_MIN + 0.5 * (LOG_STD_MAX - LOG_STD_MIN) * (jnp.tanh(head) + 1.0)
    col = jax.lax.broadcasted_iota(jnp.int32, head.shape, 1)
    out_ref[...] = jnp.where(col < act_dim, head, squashed).astype(out_ref.dtype)


def actor_forward(x, kp, *, block_b=2048):
    """x: [B, obs_dim] f32.  kp: prepared params (see prepare_actor_params)."""
    B, obs_dim = x.shape
    act_dim = kp["act_dim"]
    H = kp["w1"].shape[1]
    out_pad = kp["wh"].shape[1]

    # ---- padding-aware batch tiling -------------------------------------
    n_tiles = max(1, _cdiv(B, block_b))
    # v7x has 2 TensorCores and the "parallel" batch axis is what gets sharded
    # across them; give each core a grid step once the batch is big enough.
    if n_tiles < 2 and B >= 1024:
        n_tiles = 2
    TB = _round_up(_cdiv(B, n_tiles), 8)
    Bp = TB * n_tiles

    if Bp != B:
        # The pad materializes a copy anyway -> fuse in the f32->bf16 cast,
        # halving x DMA bytes into the kernel for free.
        x = jnp.pad(x.astype(jnp.bfloat16), ((0, Bp - B), (0, 0)))

    batch_spec = lambda shape: pl.BlockSpec(shape, lambda i: (i, 0))
    const_spec = lambda shape: pl.BlockSpec(shape, lambda i: (0, 0))

    in_specs = [
        batch_spec((TB, obs_dim)),
        const_spec(kp["w1"].shape),
        const_spec(kp["b1"].shape),
        const_spec(kp["w2"].shape),
        const_spec(kp["b2"].shape),
        const_spec(kp["wh"].shape),
        const_spec(kp["bh"].shape),
    ]

    weight_bytes = int(sum(a.size * a.dtype.itemsize
                           for a in (kp["w1"], kp["b1"], kp["w2"], kp["b2"],
                                     kp["wh"], kp["bh"])))

    # Conservative per-call VMEM footprint estimate (double-buffered I/O,
    # f32 + bf16 hidden temporaries, head/squash/iota epilogue temporaries).
    vmem_est = (
        2 * weight_bytes
        + 2 * TB * obs_dim * x.dtype.itemsize
        + 2 * TB * out_pad * 2
        + TB * H * (4 + 2) * 2
        + 3 * TB * out_pad * 4
    )
    vmem_limit = None
    if vmem_est > (24 << 20):
        # v7x scoped default is 32 MiB (64 MiB physical): raise with headroom
        # but stay well under the physical limit; v5e/v6e (128 MiB) have slack.
        vmem_limit = min(int(vmem_est * 3 // 2), 48 << 20)

    cost = pl.CostEstimate(
        flops=2 * Bp * (obs_dim * H + H * H + H * out_pad),
        transcendentals=Bp * out_pad,
        bytes_accessed=int(x.size * x.dtype.itemsize) + weight_bytes
                       + Bp * out_pad * 2,
    )

    out = pl.pallas_call(
        partial(_actor_kernel, act_dim=act_dim),
        out_shape=jax.ShapeDtypeStruct((Bp, out_pad), jnp.bfloat16),
        grid=(Bp // TB,),
        in_specs=in_specs,
        out_specs=batch_spec((TB, out_pad)),
        compiler_params=pltpu.CompilerParams(
            dimension_semantics=("parallel",),
            vmem_limit_bytes=vmem_limit),
        cost_estimate=cost,
    )(x, kp["w1"], kp["b1"], kp["w2"], kp["b2"], kp["wh"], kp["bh"])

    mean = out[:B, :act_dim].astype(jnp.float32)
    log_std = out[:B, act_dim:2 * act_dim].astype(jnp.float32)
    return mean, log_std


def init_actor_params(key, obs_dim, act_dim, hidden=256):
    """Deterministic init mimicking torch.nn.Linear default (uniform +/- 1/sqrt(fan_in)).
    Weights stored pre-transposed: [in, out], all f32 (raw / reference form)."""
    def linear(key, fan_in, fan_out):
        kw, kb = jax.random.split(key)
        bound = 1.0 / jnp.sqrt(fan_in)
        w = jax.random.uniform(kw, (fan_in, fan_out), jnp.float32, -bound, bound)
        b = jax.random.uniform(kb, (1, fan_out), jnp.float32, -bound, bound)
        return w, b

    k1, k2, k3, k4 = jax.random.split(key, 4)
    w1, b1 = linear(k1, obs_dim, hidden)
    w2, b2 = linear(k2, hidden, hidden)
    wm, bm = linear(k3, hidden, act_dim)
    ws, bs = linear(k4, hidden, act_dim)
    return dict(w1=w1, b1=b1, w2=w2, b2=b2, wm=wm, bm=bm, ws=ws, bs=bs)


def prepare_actor_params(p, act_dim):
    """One-time: fuse the two heads, zero-pad to a 128-lane output, cast MXU
    operands to bf16 (biases stay f32 for the VPU epilogue)."""
    wh = jnp.concatenate([p["wm"], p["ws"]], axis=1)   # [H, 2*act_dim]
    bh = jnp.concatenate([p["bm"], p["bs"]], axis=1)   # [1, 2*act_dim]
    out_pad = _round_up(2 * act_dim, _LANE)
    pad = out_pad - 2 * act_dim
    if pad:
        wh = jnp.pad(wh, ((0, 0), (0, pad)))
        bh = jnp.pad(bh, ((0, 0), (0, pad)))
    return dict(
        w1=p["w1"].astype(jnp.bfloat16), b1=p["b1"].astype(jnp.float32),
        w2=p["w2"].astype(jnp.bfloat16), b2=p["b2"].astype(jnp.float32),
        wh=wh.astype(jnp.bfloat16),      bh=bh.astype(jnp.float32),
        act_dim=int(act_dim),
    )


def actor_forward_ref(x, p):
    """Pure-JAX reference with the same bf16-operand / f32-accumulate math."""
    bf = jnp.bfloat16
    h1 = jnp.maximum(jnp.dot(x.astype(bf), p["w1"].astype(bf),
                             preferred_element_type=jnp.float32) + p["b1"], 0.0)
    h2 = jnp.maximum(jnp.dot(h1.astype(bf), p["w2"].astype(bf),
                             preferred_element_type=jnp.float32) + p["b2"], 0.0)
    mean = jnp.dot(h2.astype(bf), p["wm"].astype(bf),
                   preferred_element_type=jnp.float32) + p["bm"]
    log_std = jnp.dot(h2.astype(bf), p["ws"].astype(bf),
                      preferred_element_type=jnp.float32) + p["bs"]
    log_std = jnp.tanh(log_std)
    log_std = LOG_STD_MIN + 0.5 * (LOG_STD_MAX - LOG_STD_MIN) * (log_std + 1.0)
    return mean, log_std


def _check(x, raw_params, kernel_params, act_dim):
    mean, log_std = actor_forward(x, kernel_params)
    mean, log_std = jax.block_until_ready((mean, log_std))
    mean_ref, log_std_ref = actor_forward_ref(x, raw_params)
    # Kernel stores bf16; quantize the reference the same way before comparing.
    q = lambda a: a.astype(jnp.bfloat16).astype(jnp.float32)
    assert mean.shape == (x.shape[0], act_dim)
    assert log_std.shape == (x.shape[0], act_dim)
    assert jnp.allclose(mean, q(mean_ref), atol=2e-2, rtol=2e-2), "mean mismatch"
    assert jnp.allclose(log_std, q(log_std_ref), atol=5e-2, rtol=2e-2), "log_std mismatch"


if __name__ == "__main__":
    key = jax.random.PRNGKey(0)
    k_x1, k_x2, k_p = jax.random.split(key, 3)

    obs_dim, act_dim = 32, 8
    raw_params = init_actor_params(k_p, obs_dim, act_dim)
    kernel_params = prepare_actor_params(raw_params, act_dim)

    # Small batch (single tile, no padding).
    x_small = jax.random.normal(k_x1, (8, obs_dim), jnp.float32)
    _check(x_small, raw_params, kernel_params, act_dim)

    # Awkward batch: exercises padding-aware tiling + wrapper-side bf16 cast.
    x_odd = jax.random.normal(k_x2, (300, obs_dim), jnp.float32)
    _check(x_odd, raw_params, kernel_params, act_dim)

    # TODO(synk): get_action() (Normal rsample / log_prob) is sampling logic
    # outside forward(); not implemented as a kernel.
    print("KERNEL_OK")
</pallas_src>

<mosaic_0001>
module attributes {stable_mosaic.version = 11 : i64} {
  func.func @_actor_kernel(%arg0: i32, %arg1: memref<8x32xf32, #tpu.memory_space<vmem>>, %arg2: memref<32x256xbf16, #tpu.memory_space<vmem>>, %arg3: memref<1x256xf32, #tpu.memory_space<vmem>>, %arg4: memref<256x256xbf16, #tpu.memory_space<vmem>>, %arg5: memref<1x256xf32, #tpu.memory_space<vmem>>, %arg6: memref<256x128xbf16, #tpu.memory_space<vmem>>, %arg7: memref<1x128xf32, #tpu.memory_space<vmem>>, %arg8: memref<8x128xbf16, #tpu.memory_space<vmem>>) attributes {dimension_semantics = [#tpu.dimension_semantics<parallel>], iteration_bounds = array<i64: 1>, scalar_prefetch = 0 : i64, scratch_operands = 0 : i64, tpu.core_type = #tpu.core_type<tc>, window_params = [{transform_indices = @transform_0, window_bounds = array<i64: 8, 32>}, {pipeline_mode = #tpu.pipeline_mode<synchronous>, transform_indices = @transform_1, window_bounds = array<i64: 32, 256>}, {pipeline_mode = #tpu.pipeline_mode<synchronous>, transform_indices = @transform_2, window_bounds = array<i64: 1, 256>}, {pipeline_mode = #tpu.pipeline_mode<synchronous>, transform_indices = @transform_3, window_bounds = array<i64: 256, 256>}, {pipeline_mode = #tpu.pipeline_mode<synchronous>, transform_indices = @transform_4, window_bounds = array<i64: 1, 256>}, {pipeline_mode = #tpu.pipeline_mode<synchronous>, transform_indices = @transform_5, window_bounds = array<i64: 256, 128>}, {pipeline_mode = #tpu.pipeline_mode<synchronous>, transform_indices = @transform_6, window_bounds = array<i64: 1, 128>}, {transform_indices = @transform_7, window_bounds = array<i64: 8, 128>}]} {
    %c0 = arith.constant 0 : index
    %c0_0 = arith.constant 0 : index
    %0 = vector.load %arg1[%c0, %c0_0] : memref<8x32xf32, #tpu.memory_space<vmem>>, vector<8x32xf32>
    %1 = arith.truncf %0 : vector<8x32xf32> to vector<8x32xbf16>
    %c0_1 = arith.constant 0 : index
    %c0_2 = arith.constant 0 : index
    %2 = vector.load %arg2[%c0_1, %c0_2] : memref<32x256xbf16, #tpu.memory_space<vmem>>, vector<32x256xbf16>
    %cst = arith.constant dense<0.000000e+00> : vector<8x256xf32>
    %3 = tpu.matmul %1, %2, %cst {dimension_numbers = #tpu.dot_dimension_numbers<[1], [0], [0], [1], [0, 0, 1, 1], [], []>} : vector<8x32xbf16>, vector<32x256xbf16>, vector<8x256xf32> -> vector<8x256xf32>
    %c0_3 = arith.constant 0 : index
    %c0_4 = arith.constant 0 : index
    %4 = vector.load %arg3[%c0_3, %c0_4] : memref<1x256xf32, #tpu.memory_space<vmem>>, vector<1x256xf32>
    %5 = vector.broadcast %4 : vector<1x256xf32> to vector<8x256xf32>
    %6 = arith.addf %3, %5 : vector<8x256xf32>
    %cst_5 = arith.constant 0.000000e+00 : f32
    %7 = vector.broadcast %cst_5 : f32 to vector<8x256xf32>
    %8 = arith.maximumf %6, %7 : vector<8x256xf32>
    %9 = arith.truncf %8 : vector<8x256xf32> to vector<8x256xbf16>
    %c0_6 = arith.constant 0 : index
    %c0_7 = arith.constant 0 : index
    %10 = vector.load %arg4[%c0_6, %c0_7] : memref<256x256xbf16, #tpu.memory_space<vmem>>, vector<256x256xbf16>
    %cst_8 = arith.constant dense<0.000000e+00> : vector<8x256xf32>
    %11 = tpu.matmul %9, %10, %cst_8 {dimension_numbers = #tpu.dot_dimension_numbers<[1], [0], [0], [1], [0, 0, 1, 1], [], []>} : vector<8x256xbf16>, vector<256x256xbf16>, vector<8x256xf32> -> vector<8x256xf32>
    %c0_9 = arith.constant 0 : index
    %c0_10 = arith.constant 0 : index
    %12 = vector.load %arg5[%c0_9, %c0_10] : memref<1x256xf32, #tpu.memory_space<vmem>>, vector<1x256xf32>
    %13 = vector.broadcast %12 : vector<1x256xf32> to vector<8x256xf32>
    %14 = arith.addf %11, %13 : vector<8x256xf32>
    %cst_11 = arith.constant 0.000000e+00 : f32
    %15 = vector.broadcast %cst_11 : f32 to vector<8x256xf32>
    %16 = arith.maximumf %14, %15 : vector<8x256xf32>
    %17 = arith.truncf %16 : vector<8x256xf32> to vector<8x256xbf16>
    %c0_12 = arith.constant 0 : index
    %c0_13 = arith.constant 0 : index
    %18 = vector.load %arg6[%c0_12, %c0_13] : memref<256x128xbf16, #tpu.memory_space<vmem>>, vector<256x128xbf16>
    %cst_14 = arith.constant dense<0.000000e+00> : vector<8x128xf32>
    %19 = tpu.matmul %17, %18, %cst_14 {dimension_numbers = #tpu.dot_dimension_numbers<[1], [0], [0], [1], [0, 0, 1, 1], [], []>} : vector<8x256xbf16>, vector<256x128xbf16>, vector<8x128xf32> -> vector<8x128xf32>
    %c0_15 = arith.constant 0 : index
    %c0_16 = arith.constant 0 : index
    %20 = vector.load %arg7[%c0_15, %c0_16] : memref<1x128xf32, #tpu.memory_space<vmem>>, vector<1x128xf32>
    %21 = vector.broadcast %20 : vector<1x128xf32> to vector<8x128xf32>
    %22 = arith.addf %19, %21 : vector<8x128xf32>
    %23 = math.tanh %22 : vector<8x128xf32>
    %cst_17 = arith.constant 1.000000e+00 : f32
    %24 = vector.broadcast %cst_17 : f32 to vector<8x128xf32>
    %25 = arith.addf %23, %24 : vector<8x128xf32>
    %cst_18 = arith.constant 1.000000e+01 : f32
    %26 = vector.broadcast %cst_18 : f32 to vector<8x128xf32>
    %27 = arith.mulf %26, %25 : vector<8x128xf32>
    %cst_19 = arith.constant -1.000000e+01 : f32
    %28 = vector.broadcast %cst_19 : f32 to vector<8x128xf32>
    %29 = arith.addf %28, %27 : vector<8x128xf32>
    %30 = tpu.iota {dimensions = array<i32: 1>} : vector<8x128xi32>
    %c8_i32 = arith.constant 8 : i32
    %31 = vector.broadcast %c8_i32 : i32 to vector<8x128xi32>
    %32 = arith.cmpi slt, %30, %31 : vector<8x128xi32>
    %33 = arith.select %32, %22, %29 : vector<8x128xi1>, vector<8x128xf32>
    %34 = arith.truncf %33 : vector<8x128xf32> to vector<8x128xbf16>
    %c0_20 = arith.constant 0 : index
    %c0_21 = arith.constant 0 : index
    %35 = vector.load %arg8[%c0_20, %c0_21] : memref<8x128xbf16, #tpu.memory_space<vmem>>, vector<8x128xbf16>
    tpu.vector_store %arg8[%c0_20, %c0_21], %34 {strides = array<i32>} : memref<8x128xbf16, #tpu.memory_space<vmem>>, vector<8x128xbf16>,
    return
  }
  func.func @transform_0(%arg0: i32) -> (i32, i32) {
    %c0_i32 = arith.constant 0 : i32
    %c0_i32_0 = arith.constant 0 : i32
    return %arg0, %c0_i32 : i32, i32
  }
  func.func @transform_1(%arg0: i32) -> (i32, i32) {
    %c0_i32 = arith.constant 0 : i32
    %c0_i32_0 = arith.constant 0 : i32
    %c0_i32_1 = arith.constant 0 : i32
    return %c0_i32, %c0_i32_0 : i32, i32
  }
  func.func @transform_2(%arg0: i32) -> (i32, i32) {
    %c0_i32 = arith.constant 0 : i32
    %c0_i32_0 = arith.constant 0 : i32
    %c0_i32_1 = arith.constant 0 : i32
    return %c0_i32, %c0_i32_0 : i32, i32
  }
  func.func @transform_3(%arg0: i32) -> (i32, i32) {
    %c0_i32 = arith.constant 0 : i32
    %c0_i32_0 = arith.constant 0 : i32
    %c0_i32_1 = arith.constant 0 : i32
    return %c0_i32, %c0_i32_0 : i32, i32
  }
  func.func @transform_4(%arg0: i32) -> (i32, i32) {
    %c0_i32 = arith.constant 0 : i32
    %c0_i32_0 = arith.constant 0 : i32
    %c0_i32_1 = arith.constant 0 : i32
    return %c0_i32, %c0_i32_0 : i32, i32
  }
  func.func @transform_5(%arg0: i32) -> (i32, i32) {
    %c0_i32 = arith.constant 0 : i32
    %c0_i32_0 = arith.constant 0 : i32
    %c0_i32_1 = arith.constant 0 : i32
    return %c0_i32, %c0_i32_0 : i32, i32
  }
  func.func @transform_6(%arg0: i32) -> (i32, i32) {
    %c0_i32 = arith.constant 0 : i32
    %c0_i32_0 = arith.constant 0 : i32
    %c0_i32_1 = arith.constant 0 : i32
    return %c0_i32, %c0_i32_0 : i32, i32
  }
  func.func @transform_7(%arg0: i32) -> (i32, i32) {
    %c0_i32 = arith.constant 0 : i32
    %c0_i32_0 = arith.constant 0 : i32
    return %arg0, %c0_i32 : i32, i32
  }
}

</mosaic_0001>

<bundles_post_ra>
// kernel: tpu_custom_call.1
= control target key start
LH: loop header
LB: loop body
LE: loop exit
PB: predicated region body
PF: predicated region fallthrough
CT: control target
= control target key end

     0   :  { %12 = vsyncpa [#allocation3], 0  ;;  %s1112_s0 = inlined_call_operand.hbm [shape: f32[8,32], index: 0, kind: input, shape index: {}]   ;;  %s1113_s1 = inlined_call_operand.hbm [shape: bf16[32,256], index: 1, kind: input, shape index: {}]   ;;  %s1114_s2 = inlined_call_operand.hbm [shape: f32[1,256], index: 2, kind: input, shape index: {}]   ;;  %s1115_s3 = inlined_call_operand.hbm [shape: bf16[256,256], index: 3, kind: input, shape index: {}]   ;;  %s1116_s4 = inlined_call_operand.vmem [shape: f32[1,256], index: 4, kind: input, shape index: {}]   ;;  %s1117_s5 = inlined_call_operand.hbm [shape: bf16[256,128], index: 5, kind: input, shape index: {}]   ;;  %s1118_s6 = inlined_call_operand.vmem [shape: f32[1,128], index: 6, kind: input, shape index: {}]   ;;  %s1119_s7 = inlined_call_operand.hbm [shape: bf16[8,128], index: 7, kind: output, shape index: {}]  }
   0x1   :  { %13 = vsyncpa [#allocation6], 0 }
   0x2   :  { %14 = vsyncpa [#allocation9], 0  ;;  %s31_s26 = sshll.u32 %s1113_s1, 4  ;;  %s32_s26 = int_to_ptr.hbm [resolvable:$true] %s31_s26 }
   0x3   :  { %15 = vsyncpa [#allocation4], 0  ;;  %s1036_s27 = smov [#allocation5]   ;;  %s55_s8 = sshll.u32 %s1115_s3, 4  ;;  %s56_s8 = int_to_ptr.hbm [resolvable:$true] %s55_s8 }
   0x4   :  { %s33_s28 = sshll.u32 %s1036_s27, 4  ;;  %s1037_s9 = smov 128   ;;  %s34_s28 = int_to_ptr.vmem [resolvable:$true] %s33_s28 }
   0x5   :  { %s1038_s10 = smov 8   ;;  %s1039_s11 = smov [#allocation8]  }
   0x6   :  { %39 = dma.hbm_to_vmem [thread:$0]  %s32_s26, 512, %s34_s28, [#allocation6], %s1037_s9, %s1037_s9, %s1038_s10  }
   0x7   :  { %s57_s12 = sshll.u32 %s1039_s11, 4  ;;  %s21_s15 = sshll.u32 %s1112_s0, 4  ;;  %s58_s12 = int_to_ptr.vmem [resolvable:$true] %s57_s12  ;;  %s22_s15 = int_to_ptr.hbm [resolvable:$true] %s21_s15 }
   0x8   :  { %63 = dma.hbm_to_vmem [thread:$0]  %s56_s8, 4096, %s58_s12, [#allocation9], %s1037_s9, %s1037_s9, %s1038_s10  }
   0x9   :  { %s45_s17 = sshll.u32 %s1114_s2, 4  ;;  %s1040_s18 = smov [#allocation2]   ;;  %s46_s17 = int_to_ptr.hbm [resolvable:$true] %s45_s17 }
   0xa   :  { %s23_s19 = sshll.u32 %s1040_s18, 4  ;;  %s1041_s3 = smov [#allocation7]   ;;  %s24_s19 = int_to_ptr.vmem [resolvable:$true] %s23_s19 }
   0xb   :  { %26 = dma.hbm_to_vmem [thread:$0]  %s22_s15, 128, %s24_s19, [#allocation3]  }
   0xc   :  { %s47_s20 = sshll.u32 %s1041_s3, 4  ;;  %s70_s23 = sshll.u32 %s1117_s5, 4  ;;  %s48_s20 = int_to_ptr.vmem [resolvable:$true] %s47_s20  ;;  %s71_s23 = int_to_ptr.hbm [resolvable:$true] %s70_s23 }
   0xd   :  { %50 = dma.hbm_to_vmem [thread:$0]  %s46_s17, 32, %s48_s20, [#allocation6]  }
   0xe   :  { %s1042_s0 = smov [#allocation10]   ;;  %s1043_s25 = smov 64  }
   0xf   :  { %s72_s24 = sshll.u32 %s1042_s0, 4  ;;  %s1044_s26 = smov 4   ;;  %s73_s24 = int_to_ptr.vmem [resolvable:$true] %s72_s24 }
  0x10   :  { %78 = dma.hbm_to_vmem [thread:$0]  %s71_s23, 2048, %s73_s24, [#allocation9], %s1043_s25, %s1043_s25, %s1044_s26  }
  0x11   :  { %1028 = dma.done.wait [#allocation3], 128  }
  0x12   :  { %1029 = vsyncadd [#allocation3], 4294967168 }
  0x13   :  { %1030 = dma.done.wait [#allocation6], 544  }
  0x14   :  { %1031 = vsyncadd [#allocation6], 4294966752 }
  0x15   :  { %1032 = dma.done.wait [#allocation9], 6144  }
  0x16   :  { %1033 = vsyncadd [#allocation9], 4294961152  ;;  %v619_v0 = vld [vmem:[#allocation5 + $0x10] sm:$0xf]  ;;  %v822_v1 = vld [vmem:[#allocation5 + $0x14] sm:$0xf0] }
  0x17   :  { %v821_v2 = vld [vmem:[#allocation5 + $0x14] sm:$0xf]  ;;  %v620_v3 = vor.u32 %v822_v1, %v619_v0  ;;  %v621_v4 = vld [vmem:[#allocation5 + $0x18] sm:$0xf0]  ;;  %v611_v5 = vld [vmem:[#allocation5] sm:$0xf] }
  0x18   :  { %v820_v6 = vld [vmem:[#allocation5 + $0x4] sm:$0xf0]  ;;  %v624_v7 = vor.u32 %v821_v2, %v621_v4  ;;  %v819_v8 = vld [vmem:[#allocation5 + $0x4] sm:$0xf]  ;;  %v613_v9 = vld [vmem:[#allocation5 + $0x8] sm:$0xf0] }
  0x19   :  { %v102_v10 = vld [vmem:[#allocation2] sm:$0xff]  ;;  %vm134_vm0 = vcmask 261120   ;;  %144 = vmatpush.bf16.msra.mxu0 %v620_v3  ;;  %v612_v11 = vor.u32 %v820_v6, %v611_v5  ;;  %v685_v12 = vld [vmem:[#allocation8 + $0x70] sm:$0xf]  ;;  %v616_v15 = vor.u32 %v819_v8, %v613_v9  ;;  %v677_v24 = vld [vmem:[#allocation8 + $0x60] sm:$0xf] }
  0x1a   :  { %v838_v13 = vld [vmem:[#allocation8 + $0x74] sm:$0xf0]  ;;  %v749_v14 = vld [vmem:[#allocation8 + $0xf0] sm:$0xf]  ;;  %157 = vmatpush.bf16.msra.mxu1 %v624_v7  ;;  %v837_v18 = vld [vmem:[#allocation8 + $0x74] sm:$0xf]  ;;  %v103_v25 = vpack.c.bf16 %v102_v10, %v102_v10 }
  0x1b   :  { %v686_v16 = vor.u32 %v838_v13, %v685_v12  ;;  %v854_v17 = vld [vmem:[#allocation8 + $0xf4] sm:$0xf0]  ;;  %v687_v19 = vld [vmem:[#allocation8 + $0x78] sm:$0xf0]  ;;  %v853_v22 = vld [vmem:[#allocation8 + $0xf4] sm:$0xf] }
  0x1c   :  { %v750_v20 = vor.u32 %v854_v17, %v749_v14  ;;  %v690_v21 = vor.u32 %v837_v18, %v687_v19  ;;  %v751_v23 = vld [vmem:[#allocation8 + $0xf8] sm:$0xf0]  ;;  %v836_v27 = vld [vmem:[#allocation8 + $0x64] sm:$0xf0]  ;;  %v741_v28 = vld [vmem:[#allocation8 + $0xe0] sm:$0xf] }
  0x1d   :  { %366 = vmatpush.bf16.msra.mxu2 %v686_v16  ;;  %v754_v26 = vor.u32 %v853_v22, %v751_v23  ;;  %v852_v29 = vld [vmem:[#allocation8 + $0xe4] sm:$0xf0]  ;;  %145 = vmatpush.bf16.msra.mxu0 %v612_v11  ;;  %v678_v30 = vor.u32 %v836_v27, %v677_v24  ;;  %v835_v32 = vld [vmem:[#allocation8 + $0x64] sm:$0xf]  ;;  %v679_v33 = vld [vmem:[#allocation8 + $0x68] sm:$0xf0] }
  0x1e   :  { %379 = vmatpush.bf16.msra.mxu3 %v750_v20  ;;  %v742_v31 = vor.u32 %v852_v29, %v741_v28  ;;  %v851_v34 = vld [vmem:[#allocation8 + $0xe4] sm:$0xf]  ;;  %158 = vmatpush.bf16.msra.mxu1 %v616_v15  ;;  %v682_v35 = vor.u32 %v835_v32, %v679_v33  ;;  %v743_v36 = vld [vmem:[#allocation8 + $0xe8] sm:$0xf0]  ;;  %v669_v37 = vld [vmem:[#allocation8 + $0x50] sm:$0xf] }
  0x1f   :  { %v834_v38 = vld [vmem:[#allocation8 + $0x54] sm:$0xf0]  ;;  %v746_v39 = vor.u32 %v851_v34, %v743_v36  ;;  %v733_v40 = vld [vmem:[#allocation8 + $0xd0] sm:$0xf]  ;;  %v833_v42 = vld [vmem:[#allocation8 + $0x54] sm:$0xf] }
  0x20   :  { %v850_v41 = vld [vmem:[#allocation8 + $0xd4] sm:$0xf0]  ;;  %625 = vmatmul.msk.bf16.vlgmr.msra.gmra.mxu0 %vm134_vm0, %v103_v25  ;;  %v670_v43 = vor.u32 %v834_v38, %v669_v37  ;;  %v671_v44 = vld [vmem:[#allocation8 + $0x58] sm:$0xf0]  ;;  %v849_v45 = vld [vmem:[#allocation8 + $0xd4] sm:$0xf] }
  0x21   :  { %392 = vmatpush.bf16.msrb.mxu0 %v690_v21  ;;  %367 = vmatpush.bf16.msra.mxu2 %v678_v30  ;;  %v735_v46 = vld [vmem:[#allocation8 + $0xd8] sm:$0xf0]  ;;  %v734_v47 = vor.u32 %v850_v41, %v733_v40  ;;  %v661_v48 = vld [vmem:[#allocation8 + $0x40] sm:$0xf]  ;;  %v832_v49 = vld [vmem:[#allocation8 + $0x44] sm:$0xf0]  ;;  %v674_v50 = vor.u32 %v833_v42, %v671_v44 }
  0x22   :  { %405 = vmatpush.bf16.msrb.mxu1 %v754_v26  ;;  %380 = vmatpush.bf16.msra.mxu3 %v742_v31  ;;  %v725_v51 = vld [vmem:[#allocation8 + $0xc0] sm:$0xf]  ;;  %v848_v52 = vld [vmem:[#allocation8 + $0xc4] sm:$0xf0]  ;;  %v738_v53 = vor.u32 %v849_v45, %v735_v46  ;;  %v831_v54 = vld [vmem:[#allocation8 + $0x44] sm:$0xf]  ;;  %v662_v56 = vor.u32 %v832_v49, %v661_v48 }
  0x23   :  { %626 = vmatmul.msk.bf16.vlgmr.msra.gmra.mxu1 %vm134_vm0, %v103_v25  ;;  %v663_v55 = vld [vmem:[#allocation8 + $0x48] sm:$0xf0]  ;;  %v847_v57 = vld [vmem:[#allocation8 + $0xc4] sm:$0xf]  ;;  %v726_v59 = vor.u32 %v848_v52, %v725_v51  ;;  %v653_v60 = vld [vmem:[#allocation8 + $0x30] sm:$0xf] }
  0x24   :  { %v727_v58 = vld [vmem:[#allocation8 + $0xc8] sm:$0xf0]  ;;  %v830_v61 = vld [vmem:[#allocation8 + $0x34] sm:$0xf0]  ;;  %v666_v62 = vor.u32 %v831_v54, %v663_v55  ;;  %v717_v63 = vld [vmem:[#allocation8 + $0xb0] sm:$0xf] }
  0x25   :  { %393 = vmatpush.bf16.msrb.mxu0 %v682_v35  ;;  %368 = vmatpush.bf16.msra.mxu2 %v670_v43  ;;  %v846_v0 = vld [vmem:[#allocation8 + $0xb4] sm:$0xf0]  ;;  %v730_v1 = vor.u32 %v847_v57, %v727_v58  ;;  %v829_v2 = vld [vmem:[#allocation8 + $0x34] sm:$0xf]  ;;  %v655_v3 = vld [vmem:[#allocation8 + $0x38] sm:$0xf0]  ;;  %v654_v4 = vor.u32 %v830_v61, %v653_v60 }
  0x26   :  { %406 = vmatpush.bf16.msrb.mxu1 %v746_v39  ;;  %381 = vmatpush.bf16.msra.mxu3 %v734_v47  ;;  %v845_v5 = vld [vmem:[#allocation8 + $0xb4] sm:$0xf]  ;;  %v719_v6 = vld [vmem:[#allocation8 + $0xb8] sm:$0xf0]  ;;  %v718_v7 = vor.u32 %v846_v0, %v717_v63  ;;  %v645_v8 = vld [vmem:[#allocation8 + $0x20] sm:$0xf]  ;;  %v658_v10 = vor.u32 %v829_v2, %v655_v3 }
  0x27   :  { %v828_v9 = vld [vmem:[#allocation8 + $0x24] sm:$0xf0]  ;;  %v709_v11 = vld [vmem:[#allocation8 + $0xa0] sm:$0xf]  ;;  %v722_v13 = vor.u32 %v845_v5, %v719_v6  ;;  %v827_v14 = vld [vmem:[#allocation8 + $0x24] sm:$0xf] }
  0x28   :  { %v844_v12 = vld [vmem:[#allocation8 + $0xa4] sm:$0xf0]  ;;  %v647_v15 = vld [vmem:[#allocation8 + $0x28] sm:$0xf0]  ;;  %v646_v16 = vor.u32 %v828_v9, %v645_v8  ;;  %v843_v17 = vld [vmem:[#allocation8 + $0xa4] sm:$0xf] }
  0x29   :  { %394 = vmatpush.bf16.msrb.mxu0 %v674_v50  ;;  %369 = vmatpush.bf16.msra.mxu2 %v662_v56  ;;  %v711_v18 = vld [vmem:[#allocation8 + $0xa8] sm:$0xf0]  ;;  %v710_v19 = vor.u32 %v844_v12, %v709_v11  ;;  %v650_v20 = vor.u32 %v827_v14, %v647_v15  ;;  %v637_v22 = vld [vmem:[#allocation8 + $0x10] sm:$0xf]  ;;  %v826_v23 = vld [vmem:[#allocation8 + $0x14] sm:$0xf0] }
  0x2a   :  { %407 = vmatpush.bf16.msrb.mxu1 %v738_v53  ;;  %382 = vmatpush.bf16.msra.mxu3 %v726_v59  ;;  %v714_v21 = vor.u32 %v843_v17, %v711_v18  ;;  %v701_v24 = vld [vmem:[#allocation8 + $0x90] sm:$0xf]  ;;  %v638_v25 = vor.u32 %v826_v23, %v637_v22  ;;  %v842_v26 = vld [vmem:[#allocation8 + $0x94] sm:$0xf0]  ;;  %v825_v27 = vld [vmem:[#allocation8 + $0x14] sm:$0xf] }
  0x2b   :  { %v639_v28 = vld [vmem:[#allocation8 + $0x18] sm:$0xf0]  ;;  %v702_v29 = vor.u32 %v842_v26, %v701_v24  ;;  %v841_v31 = vld [vmem:[#allocation8 + $0x94] sm:$0xf]  ;;  %v629_v34 = vld [vmem:[#allocation8] sm:$0xf] }
  0x2c   :  { %v642_v30 = vor.u32 %v825_v27, %v639_v28  ;;  %v703_v32 = vld [vmem:[#allocation8 + $0x98] sm:$0xf0]  ;;  %v824_v35 = vld [vmem:[#allocation8 + $0x4] sm:$0xf0]  ;;  %v693_v36 = vld [vmem:[#allocation8 + $0x80] sm:$0xf] }
  0x2d   :  { %395 = vmatpush.bf16.msrb.mxu0 %v666_v62  ;;  %370 = vmatpush.bf16.msra.mxu2 %v654_v4  ;;  %v706_v33 = vor.u32 %v841_v31, %v703_v32  ;;  %v630_v37 = vor.u32 %v824_v35, %v629_v34  ;;  %v840_v38 = vld [vmem:[#allocation8 + $0x84] sm:$0xf0]  ;;  %v823_v39 = vld [vmem:[#allocation8 + $0x4] sm:$0xf]  ;;  %v631_v40 = vld [vmem:[#allocation8 + $0x8] sm:$0xf0] }
  0x2e   :  { %408 = vmatpush.bf16.msrb.mxu1 %v730_v1  ;;  %383 = vmatpush.bf16.msra.mxu3 %v718_v7  ;;  %v694_v41 = vor.u32 %v840_v38, %v693_v36  ;;  %v634_v42 = vor.u32 %v823_v39, %v631_v40  ;;  %v839_v43 = vld [vmem:[#allocation8 + $0x84] sm:$0xf]  ;;  %v695_v44 = vld [vmem:[#allocation8 + $0x88] sm:$0xf0]  ;;  %v870_v46 = vld [vmem:[#allocation10 + $0x78] sm:$0xff]  ;;  %v584_v36 = vlaneseq  ;;  %s1045_s28 = smov [#allocation11]  }
  0x2f   :  { %v698_v45 = vor.u32 %v839_v43, %v695_v44  ;;  %v862_v47 = vld [vmem:[#allocation10 + $0x38] sm:$0xff]  ;;  %v869_v48 = vld [vmem:[#allocation10 + $0x70] sm:$0xff]  ;;  %v868_v50 = vld [vmem:[#allocation10 + $0x68] sm:$0xff]  ;;  %s595_s29 = sshll.u32 %s1045_s28, 4  ;;  %s597_s9 = sshll.u32 %s1119_s7, 4  ;;  %s596_s29 = int_to_ptr.vmem [resolvable:$true] %s595_s29  ;;  %s598_s9 = int_to_ptr.hbm [resolvable:$true] %s597_s9 }
  0x30   :  { %v861_v49 = vld [vmem:[#allocation10 + $0x30] sm:$0xff]  ;;  %v860_v51 = vld [vmem:[#allocation10 + $0x28] sm:$0xff]  ;;  %v867_v52 = vld [vmem:[#allocation10 + $0x60] sm:$0xff]  ;;  %v585_v39 = vand.u32 127, %v584_v36 }
  0x31   :  { %396 = vmatpush.bf16.msrb.mxu0 %v658_v10  ;;  %371 = vmatpush.bf16.msra.mxu2 %v646_v16  ;;  %v859_v53 = vld [vmem:[#allocation10 + $0x20] sm:$0xff]  ;;  %v866_v54 = vld [vmem:[#allocation10 + $0x58] sm:$0xff]  ;;  %v865_v56 = vld [vmem:[#allocation10 + $0x50] sm:$0xff] }
  0x32   :  { %409 = vmatpush.bf16.msrb.mxu1 %v722_v13  ;;  %384 = vmatpush.bf16.msra.mxu3 %v710_v19  ;;  %v108_v55 = vld [vmem:[#allocation7] sm:$0x3]  ;;  %v864_v6 = vld [vmem:[#allocation10 + $0x48] sm:$0xff]  ;;  %v857_v7 = vld [vmem:[#allocation10 + $0x10] sm:$0xff]  ;;  %vm586_vm1 = vcmp.lt.s32.totalorder %v585_v39, 8 }
  0x33   :  { %v110_v57 = vperm.slane %v108_v55, 0  ;;  %v111_v58 = vperm.slane %v108_v55, 1  ;;  %v858_v5 = vld [vmem:[#allocation10 + $0x18] sm:$0xff]  ;;  %v863_v8 = vld [vmem:[#allocation10 + $0x40] sm:$0xff]  ;;  %v856_v9 = vld [vmem:[#allocation10 + $0x8] sm:$0xff] }
  0x34   :  { %v855_v10 = vld [vmem:[#allocation10] sm:$0xff]  ;;  %v200_v11 = vld [vmem:[%s1116_s4] sm:$0x3] }
  0x35   :  { %397 = vmatpush.bf16.msrb.mxu0 %v650_v20  ;;  %372 = vmatpush.bf16.msra.mxu2 %v638_v25  ;;  %v203_v12 = vperm.slane %v200_v11, 1  ;;  %v202_v17 = vperm.slane %v200_v11, 0  ;;  %v881_v31 = vld [vmem:[%s1118_s6] ss:$0 sm:$0xff] }
  0x36   :  { %410 = vmatpush.bf16.msrb.mxu1 %v714_v21  ;;  %385 = vmatpush.bf16.msra.mxu3 %v702_v29 }
  0x39   :  { %398 = vmatpush.bf16.msrb.mxu0 %v642_v30  ;;  %373 = vmatpush.bf16.msra.mxu2 %v630_v37 }
  0x3a   :  { %411 = vmatpush.bf16.msrb.mxu1 %v706_v33  ;;  %386 = vmatpush.bf16.msra.mxu3 %v694_v41 }
  0x3d   :  { %399 = vmatpush.bf16.msrb.mxu0 %v634_v42  ;;  %554 = vmatpush.bf16.msrb.mxu2 %v862_v47 }
  0x3e   :  { %412 = vmatpush.bf16.msrb.mxu1 %v698_v45  ;;  %567 = vmatpush.bf16.msrb.mxu3 %v870_v46 }
  0x41   :  { %555 = vmatpush.bf16.msrb.mxu2 %v861_v49 }
  0x42   :  { %568 = vmatpush.bf16.msrb.mxu3 %v869_v48 }
  0x45   :  { %556 = vmatpush.bf16.msrb.mxu2 %v860_v51 }
  0x46   :  { %569 = vmatpush.bf16.msrb.mxu3 %v868_v50 }
  0x49   :  { %557 = vmatpush.bf16.msrb.mxu2 %v859_v53 }
  0x4a   :  { %570 = vmatpush.bf16.msrb.mxu3 %v867_v52 }
  0x4d   :  { %558 = vmatpush.bf16.msrb.mxu2 %v858_v5 }
  0x4e   :  { %571 = vmatpush.bf16.msrb.mxu3 %v866_v54 }
  0x51   :  { %559 = vmatpush.bf16.msrb.mxu2 %v857_v7 }
  0x52   :  { %572 = vmatpush.bf16.msrb.mxu3 %v865_v56 }
  0x55   :  { %560 = vmatpush.bf16.msrb.mxu2 %v856_v9 }
  0x56   :  { %573 = vmatpush.bf16.msrb.mxu3 %v864_v6 }
  0x59   :  { %561 = vmatpush.bf16.msrb.mxu2 %v855_v10 }
  0x5a   :  { %574 = vmatpush.bf16.msrb.mxu3 %v863_v8 }
  0x9d   :  { %v147_v59 = vpop.f32.mrf.mxu0 }
  0x9e   :  { %v148_v60 = vadd.f32 %v147_v59, %v110_v57 }
  0xa0   :  { %v160_v61 = vpop.f32.mrf.mxu1  ;;  %v164_v63 = vmax.f32 %v148_v60, 0.0 }
  0xa1   :  { %v161_v62 = vadd.f32 %v160_v61, %v111_v58 }
  0xa2   :  { %v166_v1 = vpack.c.bf16 %v164_v63, %v164_v63 }
  0xa3   :  { %v165_v0 = vmax.f32 %v161_v62, 0.0 }
  0xa4   :  { %374 = vmatmul.bf16.vlgmr.msra.gmra.mxu2 %v166_v1  ;;  %400 = vmatmul.bf16.vlgmr.msrb.gmra.mxu0 %v166_v1 }
  0xa5   :  { %v167_v2 = vpack.c.bf16 %v165_v0, %v165_v0  ;;  %v149_v3 = vpop.f32.mrf.mxu0 }
  0xa7   :  { %387 = vmatmul.bf16.vlgmr.msra.gmra.mxu3 %v167_v2  ;;  %413 = vmatmul.bf16.vlgmr.msrb.gmra.mxu1 %v167_v2 }
  0xa8   :  { %v162_v4 = vpop.f32.mrf.mxu1 }
 0x121   :  { %v401_v13 = vpop.f32.mrf.mxu0 }
 0x122   :  { %v402_v14 = vadd.f32 %v401_v13, %v203_v12 }
 0x124   :  { %v414_v15 = vpop.f32.mrf.mxu1 }
 0x125   :  { %v415_v16 = vadd.f32 %v414_v15, %v402_v14 }
 0x127   :  { %v419_v18 = vmax.f32 %v415_v16, 0.0  ;;  %v375_v19 = vpop.f32.mrf.mxu2 }
 0x128   :  { %v376_v21 = vadd.f32 %v375_v19, %v202_v17 }
 0x129   :  { %v421_v20 = vpack.c.bf16 %v419_v18, %v419_v18  ;;  %v403_v23 = vpop.f32.mrf.mxu0 }
 0x12a   :  { %v388_v22 = vpop.f32.mrf.mxu3 }
 0x12b   :  { %v389_v24 = vadd.f32 %v388_v22, %v376_v21  ;;  %575 = vmatmul.bf16.vlgmr.msrb.gmra.mxu3 %v421_v20 }
 0x12c   :  { %v416_v25 = vpop.f32.mrf.mxu1 }
 0x12d   :  { %v418_v26 = vmax.f32 %v389_v24, 0.0 }
 0x12f   :  { %v420_v27 = vpack.c.bf16 %v418_v26, %v418_v26  ;;  %v377_v28 = vpop.f32.mrf.mxu2 }
 0x131   :  { %562 = vmatmul.bf16.vlgmr.msrb.gmra.mxu2 %v420_v27 }
 0x132   :  { %v390_v29 = vpop.f32.mrf.mxu3 }
 0x1ae   :  { %v576_v30 = vpop.f32.mrf.mxu3 }
 0x1b4   :  { %v563_v32 = vpop.f32.mrf.mxu2 }
 0x1b5   :  { %v564_v33 = vadd.f32 %v881_v31, %v563_v32 }
 0x1b6   :  { %v578_v34 = vpop.f32.mrf.mxu3 }
 0x1b7   :  { %v577_v35 = vadd.f32 %v576_v30, %v564_v33 }
 0x1b9   :  { %882 = vtanh.f32 %v577_v35 }
 0x1bc   :  { %v565_v37 = vpop.f32.mrf.mxu2 }
 0x1bf   :  { %v883_v38 = vpop.eup %882 }
 0x1c0   :  { %v581_v40 = vadd.f32 1.0, %v883_v38 }
 0x1c2   :  { %v582_v41 = vmul.f32 10.0, %v581_v40 }
 0x1c4   :  { %v583_v42 = vadd.f32 -10.0, %v582_v41 }
 0x1c6   :  { %v587_v43 = vsel %vm586_vm1, %v577_v35, %v583_v42 }
 0x1c7   :  { %v588_v44 = vpack.c.bf16 %v587_v43, %v587_v43 }
 0x1c9   :  { %589 = vst [vmem:[#allocation11] sm:$0xf] %v588_v44 }
 0x1ca   :  { %600 = dma.vmem_to_hbm [thread:$0]  %s596_s29, 64, %s598_s9, [#allocation4]  }
 0x1cb   :  { %1034 = dma.done.wait [#allocation4], 64  }
 0x1cc   :  { %1035 = vsyncadd [#allocation4], 4294967232 }
 0x1cd   :  { %605 = vsyncpa [#allocation3], 1 }
 0x1ce   :  { %606 = vsyncpa [#allocation6], 1 }
 0x1cf   :  { %607 = vsyncpa [#allocation9], 1 }
 0x1d0   :  { %608 = vsyncpa [#allocation4], 1 }

</bundles_post_ra>
